<compile_context>
chip_gen: v6e
topology: v6e:2x2x1
jax: 0.10.0
libtpu: 0.0.40
codegen_flags: <defaults>
</compile_context>

<pallas_src>
import math
from functools import partial

import jax
import jax.numpy as jnp
from jax.experimental import pallas as pl
from jax.experimental.pallas import tpu as pltpu

_INV_SQRT2 = 1.0 / math.sqrt(2.0)


def _round_up(x: int, m: int) -> int:
    return (x + m - 1) // m * m


def _gelu_exact(h):
    # erf-based GELU, matching torch.nn.GELU() default.
    return 0.5 * h * (1.0 + jax.lax.erf(h * _INV_SQRT2))


def _ffn_resident_kernel(x_ref, w1_ref, b1_ref, w2_ref, b2_ref, o_ref):
    # Whole FFN for one M tile; W1/W2 are fully VMEM-resident (constant index_map
    # -> fetched from HBM exactly once for the whole kernel).
    h = jnp.dot(x_ref[...], w1_ref[...], preferred_element_type=jnp.float32)
    h = _gelu_exact(h + b1_ref[...].astype(jnp.float32))
    y = jnp.dot(h.astype(w2_ref.dtype), w2_ref[...],
                preferred_element_type=jnp.float32)
    # Dropout: inference / p=0.0 -> identity.
    # TODO(synk): training-mode dropout (p>0) would need pltpu.prng_* masking here.
    o_ref[...] = (y + b2_ref[...].astype(jnp.float32)).astype(o_ref.dtype)


def _ffn_streamed_kernel(x_ref, w1_ref, b1_ref, w2_ref, b2_ref, o_ref, *acc):
    # Hidden dim H streamed as trailing ("arbitrary") grid axis; f32 accumulation.
    # If the output dtype is f32 the output block doubles as the accumulator
    # (no scratch is passed); otherwise acc[0] is an f32 VMEM scratch.
    acc_ref = acc[0] if acc else o_ref
    hi = pl.program_id(1)

    @pl.when(hi == 0)
    def _():
        acc_ref[...] = jnp.zeros_like(acc_ref)

    h = jnp.dot(x_ref[...], w1_ref[...], preferred_element_type=jnp.float32)
    h = _gelu_exact(h + b1_ref[...].astype(jnp.float32))
    acc_ref[...] += jnp.dot(h.astype(w2_ref.dtype), w2_ref[...],
                            preferred_element_type=jnp.float32)

    @pl.when(hi == pl.num_programs(1) - 1)
    def _():
        # Dropout: inference / p=0.0 -> identity.
        # TODO(synk): training-mode dropout (p>0) would need pltpu.prng_* masking.
        o_ref[...] = (acc_ref[...] + b2_ref[...].astype(jnp.float32)).astype(o_ref.dtype)


@partial(jax.jit,
         static_argnames=("tile_m", "tile_h", "compute_dtype", "resident_vmem_budget"))
def feedforward(x, w1, b1, w2, b2, *, tile_m=512, tile_h=512,
                compute_dtype=jnp.bfloat16,
                resident_vmem_budget=40 * 1024 * 1024):
    """x: (B, T, C). w1: (C, H), b1: (H,), w2: (H, C), b2: (C,). Returns (B, T, C).

    Matmuls run on the MXU in `compute_dtype` (bf16 by default) with f32 accumulation.
    Pass compute_dtype=jnp.float32 for exact-precision (slower) matmuls.
    """
    B, T, C = x.shape
    H = w1.shape[1]
    M = B * T
    cdt = jnp.dtype(compute_dtype)
    out_dt = jnp.dtype(x.dtype)
    wb, ob = cdt.itemsize, out_dt.itemsize

    # ---- M (token) tiling: large tiles for intensity; small M split into >= 2
    #      tiles so both v7x TensorCores get work on the "parallel" axis.
    tm = min(tile_m, _round_up(M, 8))
    if 8 < M <= tile_m:
        tm = max(8, _round_up(-(-M // 2), 8))
    Mp = _round_up(M, tm)

    # ---- lane-dense channel padding; 256-align larger C for 256x256 MXUs.
    Cp = _round_up(C, 128) if C <= 128 else _round_up(C, 256)
    Hp128 = _round_up(H, 128)

    # ---- resident (weights fully in VMEM, no H grid axis) vs streamed decision.
    resident_vmem = (
        2 * 2 * Cp * Hp128 * wb                 # W1 + W2 (x2 pipeline buffers)
        + 2 * tm * Cp * (wb + ob)               # x-in / out tiles (double-buffered)
        + tm * Hp128 * (4 + wb)                 # f32 GELU intermediate (+ cast copy)
    )
    use_resident = resident_vmem <= resident_vmem_budget

    if use_resident:
        Hp = Hp128
        grid = (Mp // tm,)
        in_specs = [
            pl.BlockSpec((tm, Cp), lambda i: (i, 0)),     # x row tile
            pl.BlockSpec((Cp, Hp), lambda i: (0, 0)),     # W1, resident
            pl.BlockSpec((1, Hp), lambda i: (0, 0)),      # b1, resident
            pl.BlockSpec((Hp, Cp), lambda i: (0, 0)),     # W2, resident
            pl.BlockSpec((1, Cp), lambda i: (0, 0)),      # b2, resident
        ]
        out_specs = pl.BlockSpec((tm, Cp), lambda i: (i, 0))
        scratch_shapes = []
        kernel = _ffn_resident_kernel
        dim_sem = ("parallel",)
        vmem_budget = resident_vmem
    else:
        th = min(tile_h, Hp128)
        Hp = _round_up(H, th)
        grid = (Mp // tm, Hp // th)               # M tiles parallel, H reduction last
        in_specs = [
            pl.BlockSpec((tm, Cp), lambda i, h: (i, 0)),  # x row tile
            pl.BlockSpec((Cp, th), lambda i, h: (0, h)),  # W1 column slice
            pl.BlockSpec((1, th), lambda i, h: (0, h)),   # b1 slice
            pl.BlockSpec((th, Cp), lambda i, h: (h, 0)),  # W2 row slice
            pl.BlockSpec((1, Cp), lambda i, h: (0, 0)),   # b2
        ]
        out_specs = pl.BlockSpec((tm, Cp), lambda i, h: (i, 0))
        acc_in_out = out_dt == jnp.float32        # f32 output block doubles as acc
        scratch_shapes = [] if acc_in_out else [pltpu.VMEM((tm, Cp), jnp.float32)]
        kernel = _ffn_streamed_kernel
        dim_sem = ("parallel", "arbitrary")
        vmem_budget = (2 * tm * Cp * (wb + ob)
                       + 2 * 2 * Cp * th * wb
                       + (0 if acc_in_out else tm * Cp * 4)
                       + tm * th * (4 + wb))

    vmem_limit = int(min(100 * 1024 * 1024,
                         max(32 * 1024 * 1024, vmem_budget + 16 * 1024 * 1024)))

    # Zero-pad + single compute-dtype cast (done once here, not per grid step).
    # Padded hidden cols give GELU(0)=0 against zero W2 rows; padded C cols / M
    # rows are sliced off -> exact result.
    # NOTE: for repeated calls with fixed weights, pre-pad/cast the weights once
    # at init and pass them through to avoid re-materializing them every call.
    x2d = jnp.pad(x.reshape(M, C), ((0, Mp - M), (0, Cp - C))).astype(cdt)
    w1p = jnp.pad(w1, ((0, Cp - C), (0, Hp - H))).astype(cdt)
    b1p = jnp.pad(b1, (0, Hp - H)).reshape(1, Hp).astype(jnp.float32)
    w2p = jnp.pad(w2, ((0, Hp - H), (0, Cp - C))).astype(cdt)
    b2p = jnp.pad(b2, (0, Cp - C)).reshape(1, Cp).astype(jnp.float32)

    out2d = pl.pallas_call(
        kernel,
        out_shape=jax.ShapeDtypeStruct((Mp, Cp), out_dt),
        grid_spec=pltpu.PrefetchScalarGridSpec(
            num_scalar_prefetch=0,
            grid=grid,
            in_specs=in_specs,
            out_specs=out_specs,
            scratch_shapes=scratch_shapes,
        ),
        compiler_params=pltpu.CompilerParams(
            dimension_semantics=dim_sem,
            vmem_limit_bytes=vmem_limit,
        ),
    )(x2d, w1p, b1p, w2p, b2p)

    return out2d[:M, :C].reshape(B, T, C)


def init_params(key, n_embd, dtype=jnp.float32):
    """Deterministic init mirroring nn.Linear (uniform +/- 1/sqrt(fan_in))."""
    hidden = 4 * n_embd
    k1, k2, k3, k4 = jax.random.split(key, 4)
    lim1 = 1.0 / math.sqrt(n_embd)
    lim2 = 1.0 / math.sqrt(hidden)
    # Stored as (in, out) so the kernel does x @ W + b (== PyTorch x @ W.T).
    w1 = jax.random.uniform(k1, (n_embd, hidden), dtype, -lim1, lim1)
    b1 = jax.random.uniform(k2, (hidden,), dtype, -lim1, lim1)
    w2 = jax.random.uniform(k3, (hidden, n_embd), dtype, -lim2, lim2)
    b2 = jax.random.uniform(k4, (n_embd,), dtype, -lim2, lim2)
    return w1, b1, w2, b2


def _reference(x, w1, b1, w2, b2, compute_dtype=jnp.bfloat16):
    """Pure-JAX reference mirroring the kernel's dtype choices (cast + f32 accum)."""
    B, T, C = x.shape
    cdt = jnp.dtype(compute_dtype)
    xm = x.reshape(-1, C).astype(cdt)
    h = jnp.dot(xm, w1.astype(cdt), preferred_element_type=jnp.float32)
    h = _gelu_exact(h + b1.astype(jnp.float32))
    y = jnp.dot(h.astype(cdt), w2.astype(cdt), preferred_element_type=jnp.float32)
    y = y + b2.astype(jnp.float32)
    return y.astype(x.dtype).reshape(B, T, C)


if __name__ == "__main__":
    key = jax.random.PRNGKey(0)
    kx, kp, kx2, kp2 = jax.random.split(key, 4)

    # hparams = {'n_embd': 32, 'dropout': 0.0}
    B, T, n_embd = 2, 8, 32
    x = jax.random.normal(kx, (B, T, n_embd), jnp.float32)
    w1, b1, w2, b2 = init_params(kp, n_embd)

    # 1) Default (bf16 MXU, resident-weight path at this size).
    out = jax.block_until_ready(feedforward(x, w1, b1, w2, b2))
    ref_bf16 = _reference(x, w1, b1, w2, b2, compute_dtype=jnp.bfloat16)
    ref_f32 = _reference(x, w1, b1, w2, b2, compute_dtype=jnp.float32)
    assert jnp.allclose(out, ref_bf16, atol=2e-3, rtol=2e-2), "mismatch vs bf16 reference"
    assert jnp.allclose(out, ref_f32, atol=5e-2, rtol=5e-2), "mismatch vs f32 reference (coarse)"

    # 2) Streamed-reduction path (force by disallowing resident weights).
    out_s = jax.block_until_ready(
        feedforward(x, w1, b1, w2, b2, resident_vmem_budget=0))
    assert jnp.allclose(out_s, ref_bf16, atol=2e-3, rtol=2e-2), "mismatch (streamed path)"

    # 3) Padding path: dims not multiples of 128 / tile_m, odd token count.
    B2, T2, n_embd2 = 2, 5, 48
    x2 = jax.random.normal(kx2, (B2, T2, n_embd2), jnp.float32)
    w1b, b1b, w2b, b2b = init_params(kp2, n_embd2)
    out2 = jax.block_until_ready(feedforward(x2, w1b, b1b, w2b, b2b))
    ref2 = _reference(x2, w1b, b1b, w2b, b2b, compute_dtype=jnp.bfloat16)
    assert jnp.allclose(out2, ref2, atol=2e-3, rtol=2e-2), "mismatch vs reference (padded)"

    print("KERNEL_OK")
</pallas_src>

<mosaic_0001>
module attributes {stable_mosaic.version = 11 : i64} {
  func.func @_ffn_resident_kernel(%arg0: i32, %arg1: memref<8x128xbf16, #tpu.memory_space<vmem>>, %arg2: memref<128x128xbf16, #tpu.memory_space<vmem>>, %arg3: memref<1x128xf32, #tpu.memory_space<vmem>>, %arg4: memref<128x128xbf16, #tpu.memory_space<vmem>>, %arg5: memref<1x128xf32, #tpu.memory_space<vmem>>, %arg6: memref<8x128xf32, #tpu.memory_space<vmem>>) attributes {dimension_semantics = [#tpu.dimension_semantics<parallel>], iteration_bounds = array<i64: 2>, scalar_prefetch = 0 : i64, scratch_operands = 0 : i64, tpu.core_type = #tpu.core_type<tc>, window_params = [{transform_indices = @transform_0, window_bounds = array<i64: 8, 128>}, {pipeline_mode = #tpu.pipeline_mode<synchronous>, transform_indices = @transform_1, window_bounds = array<i64: 128, 128>}, {pipeline_mode = #tpu.pipeline_mode<synchronous>, transform_indices = @transform_2, window_bounds = array<i64: 1, 128>}, {pipeline_mode = #tpu.pipeline_mode<synchronous>, transform_indices = @transform_3, window_bounds = array<i64: 128, 128>}, {pipeline_mode = #tpu.pipeline_mode<synchronous>, transform_indices = @transform_4, window_bounds = array<i64: 1, 128>}, {transform_indices = @transform_5, window_bounds = array<i64: 8, 128>}]} {
    %c0 = arith.constant 0 : index
    %c0_0 = arith.constant 0 : index
    %0 = vector.load %arg1[%c0, %c0_0] : memref<8x128xbf16, #tpu.memory_space<vmem>>, vector<8x128xbf16>
    %c0_1 = arith.constant 0 : index
    %c0_2 = arith.constant 0 : index
    %1 = vector.load %arg2[%c0_1, %c0_2] : memref<128x128xbf16, #tpu.memory_space<vmem>>, vector<128x128xbf16>
    %cst = arith.constant dense<0.000000e+00> : vector<8x128xf32>
    %2 = tpu.matmul %0, %1, %cst {dimension_numbers = #tpu.dot_dimension_numbers<[1], [0], [0], [1], [0, 0, 1, 1], [], []>} : vector<8x128xbf16>, vector<128x128xbf16>, vector<8x128xf32> -> vector<8x128xf32>
    %c0_3 = arith.constant 0 : index
    %c0_4 = arith.constant 0 : index
    %3 = vector.load %arg3[%c0_3, %c0_4] : memref<1x128xf32, #tpu.memory_space<vmem>>, vector<1x128xf32>
    %4 = vector.broadcast %3 : vector<1x128xf32> to vector<8x128xf32>
    %5 = arith.addf %2, %4 : vector<8x128xf32>
    %cst_5 = arith.constant 5.000000e-01 : f32
    %6 = vector.broadcast %cst_5 : f32 to vector<8x128xf32>
    %7 = arith.mulf %6, %5 : vector<8x128xf32>
    %cst_6 = arith.constant 0.707106769 : f32
    %8 = vector.broadcast %cst_6 : f32 to vector<8x128xf32>
    %9 = arith.mulf %5, %8 : vector<8x128xf32>
    %10 = math.erf %9 : vector<8x128xf32>
    %cst_7 = arith.constant 1.000000e+00 : f32
    %11 = vector.broadcast %cst_7 : f32 to vector<8x128xf32>
    %12 = arith.addf %11, %10 : vector<8x128xf32>
    %13 = arith.mulf %7, %12 : vector<8x128xf32>
    %14 = arith.truncf %13 : vector<8x128xf32> to vector<8x128xbf16>
    %c0_8 = arith.constant 0 : index
    %c0_9 = arith.constant 0 : index
    %15 = vector.load %arg4[%c0_8, %c0_9] : memref<128x128xbf16, #tpu.memory_space<vmem>>, vector<128x128xbf16>
    %cst_10 = arith.constant dense<0.000000e+00> : vector<8x128xf32>
    %16 = tpu.matmul %14, %15, %cst_10 {dimension_numbers = #tpu.dot_dimension_numbers<[1], [0], [0], [1], [0, 0, 1, 1], [], []>} : vector<8x128xbf16>, vector<128x128xbf16>, vector<8x128xf32> -> vector<8x128xf32>
    %c0_11 = arith.constant 0 : index
    %c0_12 = arith.constant 0 : index
    %17 = vector.load %arg5[%c0_11, %c0_12] : memref<1x128xf32, #tpu.memory_space<vmem>>, vector<1x128xf32>
    %18 = vector.broadcast %17 : vector<1x128xf32> to vector<8x128xf32>
    %19 = arith.addf %16, %18 : vector<8x128xf32>
    %c0_13 = arith.constant 0 : index
    %c0_14 = arith.constant 0 : index
    %20 = vector.load %arg6[%c0_13, %c0_14] : memref<8x128xf32, #tpu.memory_space<vmem>>, vector<8x128xf32>
    tpu.vector_store %arg6[%c0_13, %c0_14], %19 {strides = array<i32>} : memref<8x128xf32, #tpu.memory_space<vmem>>, vector<8x128xf32>,
    return
  }
  func.func @transform_0(%arg0: i32) -> (i32, i32) {
    %c0_i32 = arith.constant 0 : i32
    %c0_i32_0 = arith.constant 0 : i32
    return %arg0, %c0_i32 : i32, i32
  }
  func.func @transform_1(%arg0: i32) -> (i32, i32) {
    %c0_i32 = arith.constant 0 : i32
    %c0_i32_0 = arith.constant 0 : i32
    %c0_i32_1 = arith.constant 0 : i32
    return %c0_i32, %c0_i32_0 : i32, i32
  }
  func.func @transform_2(%arg0: i32) -> (i32, i32) {
    %c0_i32 = arith.constant 0 : i32
    %c0_i32_0 = arith.constant 0 : i32
    %c0_i32_1 = arith.constant 0 : i32
    return %c0_i32, %c0_i32_0 : i32, i32
  }
  func.func @transform_3(%arg0: i32) -> (i32, i32) {
    %c0_i32 = arith.constant 0 : i32
    %c0_i32_0 = arith.constant 0 : i32
    %c0_i32_1 = arith.constant 0 : i32
    return %c0_i32, %c0_i32_0 : i32, i32
  }
  func.func @transform_4(%arg0: i32) -> (i32, i32) {
    %c0_i32 = arith.constant 0 : i32
    %c0_i32_0 = arith.constant 0 : i32
    %c0_i32_1 = arith.constant 0 : i32
    return %c0_i32, %c0_i32_0 : i32, i32
  }
  func.func @transform_5(%arg0: i32) -> (i32, i32) {
    %c0_i32 = arith.constant 0 : i32
    %c0_i32_0 = arith.constant 0 : i32
    return %arg0, %c0_i32 : i32, i32
  }
}

</mosaic_0001>

<bundles_post_ra>
// kernel: feedforward.1
= control target key start
LH: loop header
LB: loop body
LE: loop exit
PB: predicated region body
PF: predicated region fallthrough
CT: control target
= control target key end

     0   :  { %s657_s18 = smov 0   ;;  %s736_s0 = inlined_call_operand.vmem [shape: bf16[16,128], index: 0, kind: input, shape index: {}]   ;;  %s737_s1 = inlined_call_operand.vmem [shape: bf16[128,128], index: 1, kind: input, shape index: {}]   ;;  %s738_s2 = inlined_call_operand.vmem [shape: f32[1,128], index: 2, kind: input, shape index: {}]   ;;  %s739_s3 = inlined_call_operand.vmem [shape: bf16[128,128], index: 3, kind: input, shape index: {}]   ;;  %s740_s4 = inlined_call_operand.vmem [shape: f32[1,128], index: 4, kind: input, shape index: {}]   ;;  %s741_s5 = inlined_call_operand.vmem [shape: f32[16,128], index: 5, kind: output, shape index: {}]  }
   0x1 LB: > { %s504_s19 = sadd.s32 4294967295, %s623_s18   ;;  %p508_p0 = scmp.ge.s32.totalorder %s623_s18, 1  ;;  %s623_s18 = sphi %s657_s18, %s15_s18  }
   0x2   : > { %p186_p1 = scmp.lt.s32.totalorder %s623_s18, 3 }
   0x4   : > { %p187_p2 = pnand %p508_p0, %p186_p1 }
   0x5   : > { %p212_p3 = scmp.lt.s32.totalorder (!%p187_p2), %s504_s19, 1 }
   0x6   : > { %190 = sbr.rel (%p187_p2) target bundleno = 460 (0x1cc), region = 40 }
   0xb   : > { %v599_v0 = vld [vmem:[%s737_s1 + $0x38] sm:$0xff]   ;;  %v625_v1 = vmov 0.0   ;;  %v600_v2 = vld [vmem:[%s737_s1 + $0x30] sm:$0xff]   ;;  %vm626_vm0 = vmmov 0   ;;  %v601_v3 = vld [vmem:[%s737_s1 + $0x28] sm:$0xff]   ;;  %s743_s19 = smov (!%p212_p3, %s504_s19), 1 }
   0xc   : > { %549 = vmatprep.subr.bf16.mxu0 %v625_v1  ;;  %569 = vmatprep.subr.bf16.mxu1 %v625_v1  ;;  %v607_v4 = vld [vmem:[%s739_s3 + $0x38] sm:$0xff]   ;;  %v602_v5 = vld [vmem:[%s737_s1 + $0x20] sm:$0xff]   ;;  %v608_v6 = vld [vmem:[%s739_s3 + $0x30] sm:$0xff]   ;;  %s509_s13 = sshll.u32 %s743_s19, 2  ;;  %s510_s10 = sshll.u32 %s743_s19, 3 }
   0xd   : > { %550 = vmatpush3.bf16.msra.mxu0 %v599_v0  ;;  %565 = vmatprep.mubr.msk.bf16.mxu0 %vm626_vm0, %v625_v1  ;;  %v603_v7 = vld [vmem:[%s737_s1 + $0x18] sm:$0xff]   ;;  %v604_v8 = vld [vmem:[%s737_s1 + $0x10] sm:$0xff]   ;;  %v605_v9 = vld [vmem:[%s737_s1 + $0x8] sm:$0xff]   ;;  %s215_s20 = scalar_lea.vmem %s736_s0, %s509_s13  ;;  %s219_s15 = scalar_lea.vmem %s741_s5, %s510_s10 }
   0xe   : > { %551 = vmatprep.subr.bf16.mxu0 %v625_v1  ;;  %585 = vmatprep.mubr.msk.bf16.mxu1 %vm626_vm0, %v625_v1  ;;  %v606_v10 = vld [vmem:[%s737_s1] sm:$0xff]   ;;  %v609_v12 = vld [vmem:[%s739_s3 + $0x28] sm:$0xff]   ;;  %v611_v14 = vld [vmem:[%s739_s3 + $0x18] sm:$0xff]  }
   0xf   : > { %570 = vmatpush3.bf16.msra.mxu1 %v607_v4  ;;  %v221_v11 = vld [vmem:[%s215_s20] sm:$0xf]  ;;  %v612_v15 = vld [vmem:[%s739_s3 + $0x10] sm:$0xff]   ;;  %v613_v16 = vld [vmem:[%s739_s3 + $0x8] sm:$0xff]  }
  0x10   : > { %571 = vmatprep.subr.bf16.mxu1 %v625_v1  ;;  %v610_v13 = vld [vmem:[%s739_s3 + $0x20] sm:$0xff]  }
  0x11   : > { %552 = vmatpush3.bf16.msra.mxu0 %v600_v2  ;;  %v614_v17 = vld [vmem:[%s739_s3] sm:$0xff]  }
  0x12   : > { %553 = vmatprep.subr.bf16.mxu0 %v625_v1  ;;  %v511_v18 = vld [vmem:[%s738_s2] ss:$0 sm:$0xff] }
  0x13   : > { %572 = vmatpush3.bf16.msra.mxu1 %v608_v6  ;;  %v520_v30 = vld [vmem:[%s740_s4] ss:$0 sm:$0xff] }
  0x14   : > { %573 = vmatprep.subr.bf16.mxu1 %v625_v1 }
  0x15   : > { %554 = vmatpush3.bf16.msra.mxu0 %v601_v3 }
  0x16   : > { %555 = vmatprep.subr.bf16.mxu0 %v625_v1 }
  0x17   : > { %574 = vmatpush3.bf16.msra.mxu1 %v609_v12 }
  0x18   : > { %575 = vmatprep.subr.bf16.mxu1 %v625_v1 }
  0x19   : > { %556 = vmatpush3.bf16.msra.mxu0 %v602_v5 }
  0x1a   : > { %557 = vmatprep.subr.bf16.mxu0 %v625_v1 }
  0x1b   : > { %576 = vmatpush3.bf16.msra.mxu1 %v610_v13 }
  0x1c   : > { %577 = vmatprep.subr.bf16.mxu1 %v625_v1 }
  0x1d   : > { %558 = vmatpush3.bf16.msra.mxu0 %v603_v7 }
  0x1e   : > { %559 = vmatprep.subr.bf16.mxu0 %v625_v1 }
  0x1f   : > { %578 = vmatpush3.bf16.msra.mxu1 %v611_v14 }
  0x20   : > { %579 = vmatprep.subr.bf16.mxu1 %v625_v1 }
  0x21   : > { %560 = vmatpush3.bf16.msra.mxu0 %v604_v8 }
  0x22   : > { %561 = vmatprep.subr.bf16.mxu0 %v625_v1 }
  0x23   : > { %580 = vmatpush3.bf16.msra.mxu1 %v612_v15 }
  0x24   : > { %581 = vmatprep.subr.bf16.mxu1 %v625_v1 }
  0x25   : > { %562 = vmatpush3.bf16.msra.mxu0 %v605_v9 }
  0x26   : > { %563 = vmatprep.subr.bf16.mxu0 %v625_v1 }
  0x27   : > { %582 = vmatpush3.bf16.msra.mxu1 %v613_v16 }
  0x28   : > { %583 = vmatprep.subr.bf16.mxu1 %v625_v1 }
  0x29   : > { %564 = vmatpush3.bf16.msra.mxu0 %v606_v10 }
  0x2b   : > { %584 = vmatpush3.bf16.msra.mxu1 %v614_v17 }
  0x2c   : > { %566 = vmatmul.mubr.bf16.vlgmr.msra.gmra.mxu0 %v221_v11 }
  0xec   : > { %v327_v19 = vpop.f32.mrf.mxu0 }
  0xed   : > { %v328_v20 = vadd.f32 %v511_v18, %v327_v19 }
  0xee   : > { %v567_v21 = vpop.f32.mrf.mxu0 }
  0xef   : > { %v334_v22 = vmul.f32 0.70710677, %v328_v20  ;;  %v333_v26 = vmul.f32 0.5, %v328_v20 }
  0xf0   : > { %v330_v23 = vpop.f32.mrf.mxu0 }
  0xf1   : > { %615 = verf.f32 %v334_v22 }
  0xf2   : > { %v568_v24 = vpop.f32.mrf.mxu0 }
  0xfe   : > { %v616_v25 = vpop.eup %615 }
  0xff   : > { %v336_v27 = vadd.f32 1.0, %v616_v25 }
 0x101   : > { %v337_v28 = vmul.f32 %v336_v27, %v333_v26 }
 0x103   : > { %v338_v29 = vpack.c.bf16 %v337_v28, %v337_v28 }
 0x105   : > { %586 = vmatmul.mubr.bf16.vlgmr.msra.gmra.mxu1 %v338_v29 }
 0x1c5   : > { %v444_v31 = vpop.f32.mrf.mxu1 }
 0x1c6   : > { %v445_v32 = vadd.f32 %v520_v30, %v444_v31 }
 0x1c7   : > { %v587_v33 = vpop.f32.mrf.mxu1 }
 0x1c8   : > { %450 = vst [vmem:[%s219_s15] sm:$0xff] %v445_v32 }
 0x1c9   : > { %v447_v34 = vpop.f32.mrf.mxu1 }
 0x1cb   : > { %v588_v35 = vpop.f32.mrf.mxu1 }
 0x1cc PF: > { %s15_s18 = sadd.s32 1, %s623_s18  }
 0x1cd   : > { %p12_p4 = scmp.ge.s32.totalorder %s15_s18, 4  }
 0x1cf   :  { %14 = sbr.rel (!%p12_p4) target bundleno = 1 (0x1), region = 70 }

</bundles_post_ra>
